<compile_context>
chip_gen: v6e
topology: v6e:2x2x1
jax: 0.10.0
libtpu: 0.0.40
codegen_flags: <defaults>
</compile_context>

<pallas_src>
import jax
import jax.numpy as jnp
from jax.experimental import pallas as pl
from jax.experimental.pallas import tpu as pltpu


def _round_up(x, m):
    return ((x + m - 1) // m) * m


def policy_mlp_kernel(x_ref, w1_ref, b1_ref, w2_ref, b2_ref, w3_ref, b3_ref, out_ref):
    wdt = w1_ref.dtype                       # MXU input dtype (bf16 by default)
    x = x_ref[...].astype(wdt)

    # fc1 + ReLU (f32 accumulation, f32 elementwise)
    h1 = jnp.dot(x, w1_ref[...], preferred_element_type=jnp.float32) + b1_ref[...]
    h1 = jnp.maximum(h1, 0.0)

    # fc2 + ReLU
    h2 = jnp.dot(h1.astype(wdt), w2_ref[...], preferred_element_type=jnp.float32) + b2_ref[...]
    h2 = jnp.maximum(h2, 0.0)

    # fc3: output lanes padded to 128; padded lanes carry bias = -1e30
    logits = jnp.dot(h2.astype(wdt), w3_ref[...], preferred_element_type=jnp.float32) + b3_ref[...]

    # numerically stable softmax along lanes; padded lanes contribute exp(-huge)=0
    m = jnp.max(logits, axis=-1, keepdims=True)
    e = jnp.exp(logits - m)
    denom = jnp.sum(e, axis=-1, keepdims=True)
    out_ref[...] = (e * pl.reciprocal(denom, approx=True)).astype(out_ref.dtype)


def policy_network_forward(x, params, *, tm=128):
    """x: (B, input_size) float32; params: weights pre-transposed to (in, out)."""
    w1, b1, w2, b2, w3, b3 = (
        params["w1"], params["b1"], params["w2"], params["b2"], params["w3"], params["b3"]
    )
    B, K = x.shape
    A = w3.shape[1]

    # Pad the batch up to a full MXU-M tile and the output/action dim to 128 lanes.
    b_pad = _round_up(max(B, 1), tm)
    a_pad = _round_up(A, 128)
    x_p = jnp.pad(x, ((0, b_pad - B), (0, 0)))
    if a_pad != A:
        w3 = jnp.pad(w3, ((0, 0), (0, a_pad - A)))
        b3 = jnp.pad(b3, ((0, 0), (0, a_pad - A)), constant_values=-1e30)

    grid = (b_pad // tm,)
    const = lambda arr: pl.BlockSpec(arr.shape, lambda i: (0,) * arr.ndim)

    h1, h2n = w1.shape[1], w2.shape[1]
    flops = 2 * b_pad * (K * h1 + h1 * h2n + h2n * a_pad)
    bytes_accessed = sum(a.size * a.dtype.itemsize for a in (x_p, w1, b1, w2, b2, w3, b3))
    bytes_accessed += b_pad * a_pad * 4

    out = pl.pallas_call(
        policy_mlp_kernel,
        out_shape=jax.ShapeDtypeStruct((b_pad, a_pad), jnp.float32),
        grid=grid,
        in_specs=[
            pl.BlockSpec((tm, K), lambda i: (i, 0)),   # batch-tiled activations
            const(w1), const(b1), const(w2), const(b2), const(w3), const(b3),
        ],
        out_specs=pl.BlockSpec((tm, a_pad), lambda i: (i, 0)),
        compiler_params=pltpu.CompilerParams(
            dimension_semantics=("parallel",)),        # megacore-shard batch (v7x)
        cost_estimate=pl.CostEstimate(
            flops=flops, transcendentals=b_pad * a_pad, bytes_accessed=bytes_accessed),
    )(x_p, w1, b1, w2, b2, w3, b3)

    return out[:B, :A]


def init_params(key, input_size, action_space, weight_dtype=jnp.bfloat16):
    """Synthetic init; weights stored as (in, out) == PyTorch weight.T, biases in f32."""
    k1, k2, k3, k4, k5, k6 = jax.random.split(key, 6)

    def w(k, fan_in, shape):
        return (jax.random.normal(k, shape, jnp.float32) / jnp.sqrt(fan_in)).astype(weight_dtype)

    return {
        "w1": w(k1, input_size, (input_size, 128)),
        "b1": jax.random.normal(k2, (1, 128), jnp.float32) * 0.01,
        "w2": w(k3, 128, (128, 64)),
        "b2": jax.random.normal(k4, (1, 64), jnp.float32) * 0.01,
        "w3": w(k5, 64, (64, action_space)),
        "b3": jax.random.normal(k6, (1, action_space), jnp.float32) * 0.01,
    }


def reference_forward(x, p):
    """Pure-JAX reference mirroring the kernel numerics (same weight dtype, f32 acc)."""
    cdt = p["w1"].dtype
    dot = lambda a, w: jnp.dot(a.astype(cdt), w, preferred_element_type=jnp.float32)
    h1 = jnp.maximum(dot(x, p["w1"]) + p["b1"], 0.0)
    h2 = jnp.maximum(dot(h1, p["w2"]) + p["b2"], 0.0)
    logits = dot(h2, p["w3"]) + p["b3"]
    return jax.nn.softmax(logits, axis=-1)


if __name__ == "__main__":
    key = jax.random.PRNGKey(0)
    kx, kp = jax.random.split(key)

    batch = 2
    input_size = 32
    action_space = 8

    x = jax.random.normal(kx, (batch, input_size), jnp.float32)
    params = init_params(kp, input_size, action_space)

    fwd = jax.jit(policy_network_forward)
    out = jax.block_until_ready(fwd(x, params))

    ref = reference_forward(x, params)
    assert out.shape == (batch, action_space)
    # approx reciprocal has ~2^-12 relative error; comparison is vs a reference
    # using the same bf16 weights, so tolerances stay tight.
    assert bool(jnp.allclose(jnp.sum(out, axis=-1), 1.0, atol=1e-3))
    assert bool(jnp.allclose(out, ref, atol=2e-3, rtol=2e-3))

    print("KERNEL_OK")
</pallas_src>

<mosaic_0001>
module attributes {stable_mosaic.version = 11 : i64} {
  func.func @policy_mlp_kernel(%arg0: i32, %arg1: memref<128x32xf32, #tpu.memory_space<vmem>>, %arg2: memref<32x128xbf16, #tpu.memory_space<vmem>>, %arg3: memref<1x128xf32, #tpu.memory_space<vmem>>, %arg4: memref<128x64xbf16, #tpu.memory_space<vmem>>, %arg5: memref<1x64xf32, #tpu.memory_space<vmem>>, %arg6: memref<64x128xbf16, #tpu.memory_space<vmem>>, %arg7: memref<1x128xf32, #tpu.memory_space<vmem>>, %arg8: memref<128x128xf32, #tpu.memory_space<vmem>>) attributes {dimension_semantics = [#tpu.dimension_semantics<parallel>], iteration_bounds = array<i64: 1>, scalar_prefetch = 0 : i64, scratch_operands = 0 : i64, tpu.core_type = #tpu.core_type<tc>, window_params = [{transform_indices = @transform_0, window_bounds = array<i64: 128, 32>}, {pipeline_mode = #tpu.pipeline_mode<synchronous>, transform_indices = @transform_1, window_bounds = array<i64: 32, 128>}, {pipeline_mode = #tpu.pipeline_mode<synchronous>, transform_indices = @transform_2, window_bounds = array<i64: 1, 128>}, {pipeline_mode = #tpu.pipeline_mode<synchronous>, transform_indices = @transform_3, window_bounds = array<i64: 128, 64>}, {pipeline_mode = #tpu.pipeline_mode<synchronous>, transform_indices = @transform_4, window_bounds = array<i64: 1, 64>}, {pipeline_mode = #tpu.pipeline_mode<synchronous>, transform_indices = @transform_5, window_bounds = array<i64: 64, 128>}, {pipeline_mode = #tpu.pipeline_mode<synchronous>, transform_indices = @transform_6, window_bounds = array<i64: 1, 128>}, {transform_indices = @transform_7, window_bounds = array<i64: 128, 128>}]} {
    %c0 = arith.constant 0 : index
    %c0_0 = arith.constant 0 : index
    %0 = vector.load %arg1[%c0, %c0_0] : memref<128x32xf32, #tpu.memory_space<vmem>>, vector<128x32xf32>
    %1 = arith.truncf %0 : vector<128x32xf32> to vector<128x32xbf16>
    %c0_1 = arith.constant 0 : index
    %c0_2 = arith.constant 0 : index
    %2 = vector.load %arg2[%c0_1, %c0_2] : memref<32x128xbf16, #tpu.memory_space<vmem>>, vector<32x128xbf16>
    %cst = arith.constant dense<0.000000e+00> : vector<128x128xf32>
    %3 = tpu.matmul %1, %2, %cst {dimension_numbers = #tpu.dot_dimension_numbers<[1], [0], [0], [1], [0, 0, 1, 1], [], []>} : vector<128x32xbf16>, vector<32x128xbf16>, vector<128x128xf32> -> vector<128x128xf32>
    %c0_3 = arith.constant 0 : index
    %c0_4 = arith.constant 0 : index
    %4 = vector.load %arg3[%c0_3, %c0_4] : memref<1x128xf32, #tpu.memory_space<vmem>>, vector<1x128xf32>
    %5 = vector.broadcast %4 : vector<1x128xf32> to vector<128x128xf32>
    %6 = arith.addf %3, %5 : vector<128x128xf32>
    %cst_5 = arith.constant 0.000000e+00 : f32
    %7 = vector.broadcast %cst_5 : f32 to vector<128x128xf32>
    %8 = arith.maximumf %6, %7 : vector<128x128xf32>
    %9 = arith.truncf %8 : vector<128x128xf32> to vector<128x128xbf16>
    %c0_6 = arith.constant 0 : index
    %c0_7 = arith.constant 0 : index
    %10 = vector.load %arg4[%c0_6, %c0_7] : memref<128x64xbf16, #tpu.memory_space<vmem>>, vector<128x64xbf16>
    %cst_8 = arith.constant dense<0.000000e+00> : vector<128x64xf32>
    %11 = tpu.matmul %9, %10, %cst_8 {dimension_numbers = #tpu.dot_dimension_numbers<[1], [0], [0], [1], [0, 0, 1, 1], [], []>} : vector<128x128xbf16>, vector<128x64xbf16>, vector<128x64xf32> -> vector<128x64xf32>
    %c0_9 = arith.constant 0 : index
    %c0_10 = arith.constant 0 : index
    %12 = vector.load %arg5[%c0_9, %c0_10] : memref<1x64xf32, #tpu.memory_space<vmem>>, vector<1x64xf32>
    %13 = vector.broadcast %12 : vector<1x64xf32> to vector<128x64xf32>
    %14 = arith.addf %11, %13 : vector<128x64xf32>
    %cst_11 = arith.constant 0.000000e+00 : f32
    %15 = vector.broadcast %cst_11 : f32 to vector<128x64xf32>
    %16 = arith.maximumf %14, %15 : vector<128x64xf32>
    %17 = arith.truncf %16 : vector<128x64xf32> to vector<128x64xbf16>
    %c0_12 = arith.constant 0 : index
    %c0_13 = arith.constant 0 : index
    %18 = vector.load %arg6[%c0_12, %c0_13] : memref<64x128xbf16, #tpu.memory_space<vmem>>, vector<64x128xbf16>
    %cst_14 = arith.constant dense<0.000000e+00> : vector<128x128xf32>
    %19 = tpu.matmul %17, %18, %cst_14 {dimension_numbers = #tpu.dot_dimension_numbers<[1], [0], [0], [1], [0, 0, 1, 1], [], []>} : vector<128x64xbf16>, vector<64x128xbf16>, vector<128x128xf32> -> vector<128x128xf32>
    %c0_15 = arith.constant 0 : index
    %c0_16 = arith.constant 0 : index
    %20 = vector.load %arg7[%c0_15, %c0_16] : memref<1x128xf32, #tpu.memory_space<vmem>>, vector<1x128xf32>
    %21 = vector.broadcast %20 : vector<1x128xf32> to vector<128x128xf32>
    %22 = arith.addf %19, %21 : vector<128x128xf32>
    %cst_17 = arith.constant dense<0xFF800000> : vector<128xf32>
    %23 = vector.multi_reduction <maximumf>, %22, %cst_17 [1] : vector<128x128xf32> to vector<128xf32>
    %24 = vector.shape_cast %23 : vector<128xf32> to vector<128x1xf32>
    %25 = vector.broadcast %24 : vector<128x1xf32> to vector<128x128xf32>
    %26 = arith.subf %22, %25 : vector<128x128xf32>
    %27 = math.exp %26 : vector<128x128xf32>
    %cst_18 = arith.constant dense<0.000000e+00> : vector<128xf32>
    %28 = vector.multi_reduction <add>, %27, %cst_18 [1] : vector<128x128xf32> to vector<128xf32>
    %29 = vector.shape_cast %28 : vector<128xf32> to vector<128x1xf32>
    %30 = tpu.reciprocal %29 {approx = true} : vector<128x1xf32> -> vector<128x1xf32>
    %31 = vector.broadcast %30 : vector<128x1xf32> to vector<128x128xf32>
    %32 = arith.mulf %27, %31 : vector<128x128xf32>
    %c0_19 = arith.constant 0 : index
    %c0_20 = arith.constant 0 : index
    %33 = vector.load %arg8[%c0_19, %c0_20] : memref<128x128xf32, #tpu.memory_space<vmem>>, vector<128x128xf32>
    tpu.vector_store %arg8[%c0_19, %c0_20], %32 {strides = array<i32>} : memref<128x128xf32, #tpu.memory_space<vmem>>, vector<128x128xf32>,
    return
  }
  func.func @transform_0(%arg0: i32) -> (i32, i32) {
    %c0_i32 = arith.constant 0 : i32
    %c0_i32_0 = arith.constant 0 : i32
    return %arg0, %c0_i32 : i32, i32
  }
  func.func @transform_1(%arg0: i32) -> (i32, i32) {
    %c0_i32 = arith.constant 0 : i32
    %c0_i32_0 = arith.constant 0 : i32
    %c0_i32_1 = arith.constant 0 : i32
    return %c0_i32, %c0_i32_0 : i32, i32
  }
  func.func @transform_2(%arg0: i32) -> (i32, i32) {
    %c0_i32 = arith.constant 0 : i32
    %c0_i32_0 = arith.constant 0 : i32
    %c0_i32_1 = arith.constant 0 : i32
    return %c0_i32, %c0_i32_0 : i32, i32
  }
  func.func @transform_3(%arg0: i32) -> (i32, i32) {
    %c0_i32 = arith.constant 0 : i32
    %c0_i32_0 = arith.constant 0 : i32
    %c0_i32_1 = arith.constant 0 : i32
    return %c0_i32, %c0_i32_0 : i32, i32
  }
  func.func @transform_4(%arg0: i32) -> (i32, i32) {
    %c0_i32 = arith.constant 0 : i32
    %c0_i32_0 = arith.constant 0 : i32
    %c0_i32_1 = arith.constant 0 : i32
    return %c0_i32, %c0_i32_0 : i32, i32
  }
  func.func @transform_5(%arg0: i32) -> (i32, i32) {
    %c0_i32 = arith.constant 0 : i32
    %c0_i32_0 = arith.constant 0 : i32
    %c0_i32_1 = arith.constant 0 : i32
    return %c0_i32, %c0_i32_0 : i32, i32
  }
  func.func @transform_6(%arg0: i32) -> (i32, i32) {
    %c0_i32 = arith.constant 0 : i32
    %c0_i32_0 = arith.constant 0 : i32
    %c0_i32_1 = arith.constant 0 : i32
    return %c0_i32, %c0_i32_0 : i32, i32
  }
  func.func @transform_7(%arg0: i32) -> (i32, i32) {
    %c0_i32 = arith.constant 0 : i32
    %c0_i32_0 = arith.constant 0 : i32
    return %arg0, %c0_i32 : i32, i32
  }
}

</mosaic_0001>

<bundles_post_ra>
// kernel: policy_network_forward.1
= control target key start
LH: loop header
LB: loop body
LE: loop exit
PB: predicated region body
PF: predicated region fallthrough
CT: control target
= control target key end

     0   :  { %vm74_vm0 = vcmask 261120   ;;  %vm451_vm1 = vcmask 523264   ;;  %s1257_s1 = inlined_call_operand.vmem [shape: bf16[32,128], index: 1, kind: input, shape index: {}]   ;;  %s1258_s0 = inlined_call_operand.vmem [shape: f32[128,32], index: 0, kind: input, shape index: {}]   ;;  %s1259_s3 = inlined_call_operand.vmem [shape: bf16[128,64], index: 3, kind: input, shape index: {}]   ;;  %s1260_s5 = inlined_call_operand.vmem [shape: bf16[64,128], index: 5, kind: input, shape index: {}]   ;;  %s1261_s2 = inlined_call_operand.vmem [shape: f32[1,128], index: 2, kind: input, shape index: {}]   ;;  %s1262_s4 = inlined_call_operand.vmem [shape: f32[1,64], index: 4, kind: input, shape index: {}]   ;;  %s1263_s6 = inlined_call_operand.vmem [shape: f32[1,128], index: 6, kind: input, shape index: {}]   ;;  %s1264_s7 = inlined_call_operand.vmem [shape: f32[128,128], index: 7, kind: output, shape index: {}]  }
   0x1   :  { %v884_v0 = vld [vmem:[%s1257_s1 + $0x8] sm:$0xff]   ;;  %v885_v1 = vld [vmem:[%s1257_s1] sm:$0xff]   ;;  %v29_v5 = vld [vmem:[%s1258_s0 + $0x10] sm:$0xff] }
   0x2   :  { %808 = vmatprep.subr.bf16.mxu0 %v884_v0  ;;  %v27_v2 = vld [vmem:[%s1258_s0] sm:$0xff]  ;;  %v28_v3 = vld [vmem:[%s1258_s0 + $0x8] sm:$0xff]  ;;  %v30_v6 = vld [vmem:[%s1258_s0 + $0x18] sm:$0xff] }
   0x3   :  { %809 = vmatpush3.bf16.msra.mxu0 %v884_v0  ;;  %v43_v4 = vpack.c.bf16 %v28_v3, %v27_v2  ;;  %v31_v7 = vld [vmem:[%s1258_s0 + $0x20] sm:$0xff]  ;;  %v32_v8 = vld [vmem:[%s1258_s0 + $0x28] sm:$0xff]  ;;  %v44_v9 = vpack.c.bf16 %v30_v6, %v29_v5  ;;  %v886_v11 = vld [vmem:[%s1259_s3 + $0x38] sm:$0xff]  }
   0x4   :  { %810 = vmatprep.subr.bf16.mxu0 %v885_v1  ;;  %v45_v10 = vpack.c.bf16 %v32_v8, %v31_v7  ;;  %v33_v12 = vld [vmem:[%s1258_s0 + $0x30] sm:$0xff]  ;;  %v34_v13 = vld [vmem:[%s1258_s0 + $0x38] sm:$0xff]  ;;  %v35_v15 = vld [vmem:[%s1258_s0 + $0x40] sm:$0xff]  ;;  %828 = vmatprep.subr.bf16.mxu1 %v886_v11 }
   0x5   :  { %812 = vmatprep.mubr.msk.bf16.mxu0 %vm74_vm0, %v43_v4  ;;  %v887_v14 = vld [vmem:[%s1259_s3 + $0x30] sm:$0xff]   ;;  %v36_v16 = vld [vmem:[%s1258_s0 + $0x48] sm:$0xff]  ;;  %829 = vmatpush3.bf16.msra.mxu1 %v886_v11  ;;  %v46_v18 = vpack.c.bf16 %v34_v13, %v33_v12  ;;  %v889_v20 = vld [vmem:[%s1259_s3 + $0x20] sm:$0xff]  }
   0x6   :  { %830 = vmatprep.subr.bf16.mxu1 %v887_v14  ;;  %v888_v17 = vld [vmem:[%s1259_s3 + $0x28] sm:$0xff]   ;;  %v47_v19 = vpack.c.bf16 %v36_v16, %v35_v15  ;;  %v37_v21 = vld [vmem:[%s1258_s0 + $0x50] sm:$0xff]  ;;  %v38_v22 = vld [vmem:[%s1258_s0 + $0x58] sm:$0xff] }
   0x7   :  { %811 = vmatpush3.bf16.msra.mxu0 %v885_v1  ;;  %v39_v23 = vld [vmem:[%s1258_s0 + $0x60] sm:$0xff]  ;;  %v40_v24 = vld [vmem:[%s1258_s0 + $0x68] sm:$0xff]  ;;  %v890_v25 = vld [vmem:[%s1259_s3 + $0x18] sm:$0xff]   ;;  %v48_v26 = vpack.c.bf16 %v38_v22, %v37_v21 }
   0x8   :  { %v49_v27 = vpack.c.bf16 %v40_v24, %v39_v23  ;;  %v41_v28 = vld [vmem:[%s1258_s0 + $0x70] sm:$0xff]  ;;  %v42_v29 = vld [vmem:[%s1258_s0 + $0x78] sm:$0xff]  ;;  %v892_v32 = vld [vmem:[%s1259_s3 + $0x8] sm:$0xff]  }
   0x9   :  { %831 = vmatpush3.bf16.msra.mxu1 %v887_v14  ;;  %v50_v30 = vpack.c.bf16 %v42_v29, %v41_v28  ;;  %v891_v31 = vld [vmem:[%s1259_s3 + $0x10] sm:$0xff]   ;;  %v893_v33 = vld [vmem:[%s1259_s3] sm:$0xff]   ;;  %v894_v34 = vld [vmem:[%s1260_s5 + $0x18] sm:$0xff]  }
   0xa   :  { %813 = vmatmul.mubr.msk.bf16.vlgmr.msra.gmra.mxu0 %vm74_vm0, %v44_v9  ;;  %832 = vmatprep.subr.bf16.mxu1 %v888_v17  ;;  %v895_v35 = vld [vmem:[%s1260_s5 + $0x10] sm:$0xff]   ;;  %v896_v36 = vld [vmem:[%s1260_s5 + $0x8] sm:$0xff]   ;;  %v737_v39 = vld [vmem:[%s1261_s2] ss:$0 sm:$0xff] }
   0xb   :  { %816 = vmatprep.mubr.msk.bf16.mxu0 %vm74_vm0, %v45_v10  ;;  %860 = vmatprep.subr.bf16.mxu0 %v894_v34 }
   0xc   :  { %861 = vmatpush3.bf16.msra.mxu0 %v894_v34 }
   0xd   :  { %833 = vmatpush3.bf16.msra.mxu1 %v888_v17  ;;  %862 = vmatprep.subr.bf16.mxu0 %v895_v35 }
   0xe   :  { %834 = vmatprep.subr.bf16.mxu1 %v889_v20 }
  0x10   :  { %863 = vmatpush3.bf16.msra.mxu0 %v895_v35 }
  0x11   :  { %835 = vmatpush3.bf16.msra.mxu1 %v889_v20  ;;  %864 = vmatprep.subr.bf16.mxu0 %v896_v36 }
  0x12   :  { %817 = vmatmul.mubr.msk.bf16.gmra.mxu0 %vm74_vm0, %v46_v18  ;;  %836 = vmatprep.subr.bf16.mxu1 %v890_v25 }
  0x13   :  { %820 = vmatprep.mubr.msk.bf16.mxu0 %vm74_vm0, %v47_v19 }
  0x14   :  { %865 = vmatpush3.bf16.msra.mxu0 %v896_v36 }
  0x15   :  { %837 = vmatpush3.bf16.msra.mxu1 %v890_v25 }
  0x16   :  { %838 = vmatprep.subr.bf16.mxu1 %v891_v31 }
  0x19   :  { %839 = vmatpush3.bf16.msra.mxu1 %v891_v31 }
  0x1a   :  { %821 = vmatmul.mubr.msk.bf16.gmra.mxu0 %vm74_vm0, %v48_v26  ;;  %840 = vmatprep.subr.bf16.mxu1 %v892_v32 }
  0x1b   :  { %824 = vmatprep.mubr.msk.bf16.mxu0 %vm74_vm0, %v49_v27 }
  0x1d   :  { %841 = vmatpush3.bf16.msra.mxu1 %v892_v32 }
  0x1e   :  { %842 = vmatprep.subr.bf16.mxu1 %v893_v33 }
  0x21   :  { %843 = vmatpush3.bf16.msra.mxu1 %v893_v33  ;;  %v748_v33 = vld [vmem:[%s1262_s4] ss:$0 sm:$0xff] }
  0x22   :  { %825 = vmatmul.mubr.msk.bf16.gmra.mxu0 %vm74_vm0, %v50_v30  ;;  %v897_v30 = vld [vmem:[%s1260_s5] sm:$0xff]  }
  0x23   :  { %866 = vmatprep.subr.bf16.mxu0 %v897_v30 }
  0x24   :  { %867 = vmatpush3.bf16.msra.mxu0 %v897_v30 }
  0xca   :  { %v814_v37 = vpop.f32.mrf.mxu0 }
  0xcb   :  { %v142_v43 = vadd.f32 %v814_v37, %v737_v39 }
  0xcc   :  { %v133_v38 = vpop.f32.mrf.mxu0 }
  0xcd   :  { %v134_v41 = vadd.f32 %v737_v39, %v133_v38  ;;  %v198_v50 = vmax.f32 %v142_v43, 0.0 }
  0xce   :  { %v815_v40 = vpop.f32.mrf.mxu0 }
  0xcf   :  { %v145_v42 = vadd.f32 %v815_v40, %v737_v39  ;;  %v196_v48 = vmax.f32 %v134_v41, 0.0 }
  0xd0   :  { %v136_v44 = vpop.f32.mrf.mxu0 }
  0xd1   :  { %v137_v45 = vadd.f32 %v737_v39, %v136_v44  ;;  %v199_v46 = vmax.f32 %v145_v42, 0.0 }
  0xd2   :  { %v818_v47 = vpop.f32.mrf.mxu0 }
  0xd3   :  { %v197_v49 = vmax.f32 %v137_v45, 0.0  ;;  %v213_v53 = vpack.c.bf16 %v199_v46, %v198_v50  ;;  %v158_v57 = vadd.f32 %v818_v47, %v737_v39 }
  0xd4   :  { %v149_v51 = vpop.f32.mrf.mxu0 }
  0xd5   :  { %v212_v52 = vpack.c.bf16 %v197_v49, %v196_v48  ;;  %v150_v55 = vadd.f32 %v737_v39, %v149_v51  ;;  %v202_v0 = vmax.f32 %v158_v57, 0.0 }
  0xd6   :  { %v819_v54 = vpop.f32.mrf.mxu0 }
  0xd7   :  { %v161_v56 = vadd.f32 %v819_v54, %v737_v39  ;;  %844 = vmatprep.mubr.bf16.mxu1 %v212_v52  ;;  %v200_v62 = vmax.f32 %v150_v55, 0.0 }
  0xd8   :  { %v152_v58 = vpop.f32.mrf.mxu0  ;;  %845 = vmatmul.mubr.bf16.vlgmr.msra.gmra.mxu1 %v213_v53 }
  0xd9   :  { %v153_v59 = vadd.f32 %v737_v39, %v152_v58  ;;  %v203_v60 = vmax.f32 %v161_v56, 0.0 }
  0xda   :  { %v822_v61 = vpop.f32.mrf.mxu0 }
  0xdb   :  { %v201_v63 = vmax.f32 %v153_v59, 0.0  ;;  %v215_v3 = vpack.c.bf16 %v203_v60, %v202_v0  ;;  %v174_v7 = vadd.f32 %v822_v61, %v737_v39 }
  0xdc   :  { %v165_v1 = vpop.f32.mrf.mxu0 }
  0xdd   :  { %v214_v2 = vpack.c.bf16 %v201_v63, %v200_v62  ;;  %v166_v5 = vadd.f32 %v737_v39, %v165_v1  ;;  %v206_v14 = vmax.f32 %v174_v7, 0.0 }
  0xde   :  { %v823_v4 = vpop.f32.mrf.mxu0 }
  0xdf   :  { %v177_v6 = vadd.f32 %v823_v4, %v737_v39  ;;  %848 = vmatprep.mubr.bf16.mxu1 %v214_v2  ;;  %v204_v12 = vmax.f32 %v166_v5, 0.0 }
  0xe0   :  { %v168_v8 = vpop.f32.mrf.mxu0  ;;  %849 = vmatmul.mubr.bf16.gmra.mxu1 %v215_v3 }
  0xe1   :  { %v169_v9 = vadd.f32 %v737_v39, %v168_v8  ;;  %v207_v10 = vmax.f32 %v177_v6, 0.0 }
  0xe2   :  { %v826_v11 = vpop.f32.mrf.mxu0 }
  0xe3   :  { %v205_v13 = vmax.f32 %v169_v9, 0.0  ;;  %v217_v17 = vpack.c.bf16 %v207_v10, %v206_v14  ;;  %v190_v21 = vadd.f32 %v826_v11, %v737_v39 }
  0xe4   :  { %v181_v15 = vpop.f32.mrf.mxu0 }
  0xe5   :  { %v216_v16 = vpack.c.bf16 %v205_v13, %v204_v12  ;;  %v182_v19 = vadd.f32 %v737_v39, %v181_v15  ;;  %v210_v27 = vmax.f32 %v190_v21, 0.0 }
  0xe6   :  { %v827_v18 = vpop.f32.mrf.mxu0 }
  0xe7   :  { %v193_v20 = vadd.f32 %v827_v18, %v737_v39  ;;  %852 = vmatprep.mubr.bf16.mxu1 %v216_v16  ;;  %v208_v25 = vmax.f32 %v182_v19, 0.0 }
  0xe8   :  { %v184_v22 = vpop.f32.mrf.mxu0  ;;  %853 = vmatmul.mubr.bf16.gmra.mxu1 %v217_v17 }
  0xe9   :  { %v185_v23 = vadd.f32 %v737_v39, %v184_v22  ;;  %v211_v24 = vmax.f32 %v193_v20, 0.0 }
  0xeb   :  { %v209_v26 = vmax.f32 %v185_v23, 0.0  ;;  %v219_v29 = vpack.c.bf16 %v211_v24, %v210_v27  ;;  %v757_v24 = vld [vmem:[%s1263_s6] ss:$0 sm:$0xff] }
  0xed   :  { %v218_v28 = vpack.c.bf16 %v209_v26, %v208_v25 }
  0xef   :  { %856 = vmatprep.mubr.bf16.mxu1 %v218_v28 }
  0xf0   :  { %857 = vmatmul.mubr.bf16.gmra.mxu1 %v219_v29 }
 0x198   :  { %v846_v31 = vpop.f32.mrf.mxu1 }
 0x199   :  { %v334_v37 = vadd.f32 %v846_v31, %v748_v33 }
 0x19a   :  { %v325_v32 = vpop.f32.mrf.mxu1 }
 0x19b   :  { %v326_v35 = vadd.f32 %v748_v33, %v325_v32  ;;  %v390_v44 = vmax.f32 %v334_v37, 0.0 }
 0x19c   :  { %v847_v34 = vpop.f32.mrf.mxu1 }
 0x19d   :  { %v337_v36 = vadd.f32 %v847_v34, %v748_v33  ;;  %v388_v42 = vmax.f32 %v326_v35, 0.0 }
 0x19e   :  { %v328_v38 = vpop.f32.mrf.mxu1 }
 0x19f   :  { %v329_v39 = vadd.f32 %v748_v33, %v328_v38  ;;  %v391_v40 = vmax.f32 %v337_v36, 0.0 }
 0x1a0   :  { %v850_v41 = vpop.f32.mrf.mxu1 }
 0x1a1   :  { %v389_v43 = vmax.f32 %v329_v39, 0.0  ;;  %v405_v47 = vpack.c.bf16 %v391_v40, %v390_v44  ;;  %v350_v51 = vadd.f32 %v850_v41, %v748_v33 }
 0x1a2   :  { %v341_v45 = vpop.f32.mrf.mxu1 }
 0x1a3   :  { %v404_v46 = vpack.c.bf16 %v389_v43, %v388_v42  ;;  %v342_v49 = vadd.f32 %v748_v33, %v341_v45  ;;  %v394_v58 = vmax.f32 %v350_v51, 0.0 }
 0x1a4   :  { %v851_v48 = vpop.f32.mrf.mxu1 }
 0x1a5   :  { %v353_v50 = vadd.f32 %v851_v48, %v748_v33  ;;  %868 = vmatprep.mubr.msk.bf16.mxu0 %vm451_vm1, %v404_v46  ;;  %v392_v56 = vmax.f32 %v342_v49, 0.0 }
 0x1a6   :  { %v344_v52 = vpop.f32.mrf.mxu1  ;;  %869 = vmatmul.mubr.msk.bf16.vlgmr.msra.gmra.mxu0 %vm451_vm1, %v405_v47 }
 0x1a7   :  { %v345_v53 = vadd.f32 %v748_v33, %v344_v52  ;;  %v395_v54 = vmax.f32 %v353_v50, 0.0 }
 0x1a8   :  { %v854_v55 = vpop.f32.mrf.mxu1 }
 0x1a9   :  { %v393_v57 = vmax.f32 %v345_v53, 0.0  ;;  %v407_v61 = vpack.c.bf16 %v395_v54, %v394_v58  ;;  %v366_v1 = vadd.f32 %v854_v55, %v748_v33 }
 0x1aa   :  { %v357_v59 = vpop.f32.mrf.mxu1 }
 0x1ab   :  { %v406_v60 = vpack.c.bf16 %v393_v57, %v392_v56  ;;  %v358_v63 = vadd.f32 %v748_v33, %v357_v59  ;;  %v398_v8 = vmax.f32 %v366_v1, 0.0 }
 0x1ac   :  { %v855_v62 = vpop.f32.mrf.mxu1 }
 0x1ad   :  { %v369_v0 = vadd.f32 %v855_v62, %v748_v33  ;;  %872 = vmatprep.mubr.msk.bf16.mxu0 %vm451_vm1, %v406_v60  ;;  %v396_v6 = vmax.f32 %v358_v63, 0.0 }
 0x1ae   :  { %v360_v2 = vpop.f32.mrf.mxu1  ;;  %873 = vmatmul.mubr.msk.bf16.gmra.mxu0 %vm451_vm1, %v407_v61 }
 0x1af   :  { %v361_v3 = vadd.f32 %v748_v33, %v360_v2  ;;  %v399_v4 = vmax.f32 %v369_v0, 0.0 }
 0x1b0   :  { %v858_v5 = vpop.f32.mrf.mxu1 }
 0x1b1   :  { %v397_v7 = vmax.f32 %v361_v3, 0.0  ;;  %v409_v11 = vpack.c.bf16 %v399_v4, %v398_v8  ;;  %v382_v15 = vadd.f32 %v858_v5, %v748_v33 }
 0x1b2   :  { %v373_v9 = vpop.f32.mrf.mxu1 }
 0x1b3   :  { %v408_v10 = vpack.c.bf16 %v397_v7, %v396_v6  ;;  %v374_v13 = vadd.f32 %v748_v33, %v373_v9  ;;  %v402_v21 = vmax.f32 %v382_v15, 0.0 }
 0x1b4   :  { %v859_v12 = vpop.f32.mrf.mxu1 }
 0x1b5   :  { %v385_v14 = vadd.f32 %v859_v12, %v748_v33  ;;  %876 = vmatprep.mubr.msk.bf16.mxu0 %vm451_vm1, %v408_v10  ;;  %v400_v19 = vmax.f32 %v374_v13, 0.0 }
 0x1b6   :  { %v376_v16 = vpop.f32.mrf.mxu1  ;;  %877 = vmatmul.mubr.msk.bf16.gmra.mxu0 %vm451_vm1, %v409_v11 }
 0x1b7   :  { %v377_v17 = vadd.f32 %v748_v33, %v376_v16  ;;  %v403_v18 = vmax.f32 %v385_v14, 0.0 }
 0x1b9   :  { %v401_v20 = vmax.f32 %v377_v17, 0.0  ;;  %v411_v23 = vpack.c.bf16 %v403_v18, %v402_v21 }
 0x1bb   :  { %v410_v22 = vpack.c.bf16 %v401_v20, %v400_v19 }
 0x1bd   :  { %880 = vmatprep.mubr.msk.bf16.mxu0 %vm451_vm1, %v410_v22 }
 0x1be   :  { %881 = vmatmul.mubr.msk.bf16.gmra.mxu0 %vm451_vm1, %v411_v23 }
 0x266   :  { %v870_v25 = vpop.f32.mrf.mxu0 }
 0x267   :  { %v519_v26 = vadd.f32 %v870_v25, %v757_v24 }
 0x268   :  { %v510_v27 = vpop.f32.mrf.mxu0 }
 0x269   :  { %v511_v28 = vadd.f32 %v757_v24, %v510_v27  ;;  %577 = vmax.xlane.f32.xlu1 %v519_v26 }
 0x26a   :  { %v871_v29 = vpop.f32.mrf.mxu0 }
 0x26b   :  { %v522_v30 = vadd.f32 %v871_v29, %v757_v24  ;;  %573 = vmax.xlane.f32.xlu0 %v511_v28 }
 0x26c   :  { %v513_v31 = vpop.f32.mrf.mxu0 }
 0x26d   :  { %v514_v32 = vadd.f32 %v757_v24, %v513_v31  ;;  %579 = vmax.xlane.f32.xlu1 %v522_v30 }
 0x26e   :  { %v874_v33 = vpop.f32.mrf.mxu0 }
 0x26f   :  { %575 = vmax.xlane.f32.xlu0 %v514_v32  ;;  %v535_v35 = vadd.f32 %v874_v33, %v757_v24 }
 0x270   :  { %v526_v34 = vpop.f32.mrf.mxu0 }
 0x271   :  { %v527_v39 = vadd.f32 %v757_v24, %v526_v34 }
 0x272   :  { %v875_v36 = vpop.f32.mrf.mxu0 }
 0x273   :  { %v538_v37 = vadd.f32 %v875_v36, %v757_v24  ;;  %585 = vmax.xlane.f32.xlu0 %v535_v35 }
 0x274   :  { %v529_v38 = vpop.f32.mrf.mxu0 }
 0x275   :  { %587 = vmax.xlane.f32.xlu1 %v538_v37  ;;  %v530_v41 = vadd.f32 %v757_v24, %v529_v38 }
 0x276   :  { %v878_v40 = vpop.f32.mrf.mxu0 }
 0x277   :  { %581 = vmax.xlane.f32.xlu0 %v527_v39  ;;  %v551_v43 = vadd.f32 %v878_v40, %v757_v24 }
 0x278   :  { %v542_v42 = vpop.f32.mrf.mxu0 }
 0x279   :  { %583 = vmax.xlane.f32.xlu1 %v530_v41  ;;  %v1119_v47 = vadd.f32 %v757_v24, %v542_v42 }
 0x27a   :  { %v879_v44 = vpop.f32.mrf.mxu0 }
 0x27b   :  { %v1117_v45 = vadd.f32 %v879_v44, %v757_v24  ;;  %593 = vmax.xlane.f32.xlu0 %v551_v43 }
 0x27c   :  { %v545_v46 = vpop.f32.mrf.mxu0 }
 0x27d   :  { %595 = vmax.xlane.f32.xlu1 %v1117_v45  ;;  %v1122_v49 = vadd.f32 %v757_v24, %v545_v46 }
 0x27e   :  { %v882_v48 = vpop.f32.mrf.mxu0 }
 0x27f   :  { %589 = vmax.xlane.f32.xlu0 %v1119_v47  ;;  %v1129_v54 = vadd.f32 %v882_v48, %v757_v24 }
 0x280   :  { %v558_v50 = vpop.f32.mrf.mxu0 }
 0x281   :  { %v1125_v51 = vadd.f32 %v757_v24, %v558_v50  ;;  %591 = vmax.xlane.f32.xlu1 %v1122_v49 }
 0x282   :  { %v883_v52 = vpop.f32.mrf.mxu0 }
 0x283   :  { %597 = vmax.xlane.f32.xlu0 %v1125_v51  ;;  %v1135_v56 = vadd.f32 %v883_v52, %v757_v24 }
 0x284   :  { %v561_v53 = vpop.f32.mrf.mxu0 }
 0x285   :  { %v1131_v55 = vadd.f32 %v757_v24, %v561_v53 }
 0x287   :  { %599 = vmax.xlane.f32.xlu1 %v1131_v55  ;;  %601 = vmax.xlane.f32.xlu0 %v1129_v54 }
 0x28b   :  { %603 = vmax.xlane.f32.xlu1 %v1135_v56 }
 0x2f2   :  { %v578_v57 = vpop.xlane.xlu1 %577 }
 0x2f3   :  { %v607_v58 = vsub.f32 %v519_v26, %v578_v57 }
 0x2f4   :  { %v574_v59 = vpop.xlane.xlu0 %573 }
 0x2f5   :  { %v625_v60 = vmul.f32 1.442695, %v607_v58  ;;  %v605_v61 = vsub.f32 %v511_v28, %v574_v59 }
 0x2f6   :  { %v580_v62 = vpop.xlane.xlu1 %579 }
 0x2f7   :  { %898 = vpow2.f32 %v625_v60  ;;  %v621_v63 = vmul.f32 1.442695, %v605_v61  ;;  %v608_v0 = vsub.f32 %v522_v30, %v580_v62 }
 0x2f8   :  { %v576_v1 = vpop.xlane.xlu0 %575 }
 0x2f9   :  { %v627_v2 = vmul.f32 1.442695, %v608_v0  ;;  %v606_v3 = vsub.f32 %v514_v32, %v576_v1  ;;  %900 = vpow2.f32 %v621_v63 }
 0x2fb   :  { %902 = vpow2.f32 %v627_v2  ;;  %v623_v4 = vmul.f32 1.442695, %v606_v3 }
 0x2fc   :  { %v586_v5 = vpop.xlane.xlu0 %585 }
 0x2fd   :  { %v611_v6 = vsub.f32 %v535_v35, %v586_v5  ;;  %904 = vpow2.f32 %v623_v4 }
 0x2fe   :  { %v588_v7 = vpop.xlane.xlu1 %587 }
 0x2ff   :  { %v633_v8 = vmul.f32 1.442695, %v611_v6  ;;  %v612_v9 = vsub.f32 %v538_v37, %v588_v7 }
 0x300   :  { %v582_v10 = vpop.xlane.xlu0 %581 }
 0x301   :  { %906 = vpow2.f32 %v633_v8  ;;  %v635_v11 = vmul.f32 1.442695, %v612_v9  ;;  %v609_v12 = vsub.f32 %v527_v39, %v582_v10 }
 0x302   :  { %v584_v13 = vpop.xlane.xlu1 %583 }
 0x303   :  { %908 = vpow2.f32 %v635_v11  ;;  %v629_v14 = vmul.f32 1.442695, %v609_v12  ;;  %v610_v15 = vsub.f32 %v530_v41, %v584_v13 }
 0x304   :  { %v1138_v16 = vpop.eup %898  ;;  %v594_v17 = vpop.xlane.xlu0 %593 }
 0x305   :  { %910 = vpow2.f32 %v629_v14  ;;  %v631_v18 = vmul.f32 1.442695, %v610_v15  ;;  %v615_v19 = vsub.f32 %v551_v43, %v594_v17  ;;  %657 = vadd.xlane.f32.xlu0 %v1138_v16 }
 0x306   :  { %v596_v20 = vpop.xlane.xlu1 %595  ;;  %v1141_v21 = vpop.eup %900 }
 0x307   :  { %912 = vpow2.f32 %v631_v18  ;;  %v641_v22 = vmul.f32 1.442695, %v615_v19  ;;  %v616_v23 = vsub.f32 %v1117_v45, %v596_v20 }
 0x308   :  { %v1144_v24 = vpop.eup %902  ;;  %v590_v25 = vpop.xlane.xlu0 %589 }
 0x309   :  { %914 = vpow2.f32 %v641_v22  ;;  %v643_v26 = vmul.f32 1.442695, %v616_v23  ;;  %v613_v27 = vsub.f32 %v1119_v47, %v590_v25  ;;  %659 = vadd.xlane.f32.xlu1 %v1144_v24  ;;  %653 = vadd.xlane.f32.xlu0 %v1141_v21 }
 0x30a   :  { %v592_v28 = vpop.xlane.xlu1 %591  ;;  %v1150_v31 = vpop.eup %904 }
 0x30b   :  { %916 = vpow2.f32 %v643_v26  ;;  %v637_v29 = vmul.f32 1.442695, %v613_v27  ;;  %v614_v30 = vsub.f32 %v1122_v49, %v592_v28 }
 0x30c   :  { %v598_v32 = vpop.xlane.xlu0 %597 }
 0x30d   :  { %918 = vpow2.f32 %v637_v29  ;;  %v639_v33 = vmul.f32 1.442695, %v614_v30  ;;  %v617_v34 = vsub.f32 %v1125_v51, %v598_v32  ;;  %655 = vadd.xlane.f32.xlu1 %v1150_v31 }
 0x30e   :  { %v1154_v35 = vpop.eup %906 }
 0x30f   :  { %920 = vpow2.f32 %v639_v33  ;;  %v645_v36 = vmul.f32 1.442695, %v617_v34  ;;  %665 = vadd.xlane.f32.xlu0 %v1154_v35 }
 0x310   :  { %v1157_v37 = vpop.eup %908  ;;  %v600_v38 = vpop.xlane.xlu1 %599 }
 0x311   :  { %v602_v39 = vpop.xlane.xlu0 %601  ;;  %922 = vpow2.f32 %v645_v36  ;;  %v618_v40 = vsub.f32 %v1131_v55, %v600_v38  ;;  %667 = vadd.xlane.f32.xlu1 %v1157_v37 }
 0x312   :  { %v619_v41 = vsub.f32 %v1129_v54, %v602_v39  ;;  %v1162_v42 = vpop.eup %910 }
 0x313   :  { %v647_v43 = vmul.f32 1.442695, %v618_v40  ;;  %661 = vadd.xlane.f32.xlu0 %v1162_v42 }
 0x314   :  { %v649_v44 = vmul.f32 1.442695, %v619_v41  ;;  %v1165_v45 = vpop.eup %912  ;;  %v604_v46 = vpop.xlane.xlu1 %603 }
 0x315   :  { %924 = vpow2.f32 %v647_v43  ;;  %v620_v47 = vsub.f32 %v1135_v56, %v604_v46  ;;  %663 = vadd.xlane.f32.xlu1 %v1165_v45 }
 0x316   :  { %v1169_v48 = vpop.eup %914  ;;  %926 = vpow2.f32 %v649_v44 }
 0x317   :  { %v651_v49 = vmul.f32 1.442695, %v620_v47  ;;  %673 = vadd.xlane.f32.xlu0 %v1169_v48 }
 0x318   :  { %v1172_v50 = vpop.eup %916 }
 0x319   :  { %928 = vpow2.f32 %v651_v49  ;;  %675 = vadd.xlane.f32.xlu1 %v1172_v50 }
 0x31a   :  { %v1175_v51 = vpop.eup %918 }
 0x31b   :  { %669 = vadd.xlane.f32.xlu0 %v1175_v51 }
 0x31c   :  { %v1178_v52 = vpop.eup %920 }
 0x31d   :  { %671 = vadd.xlane.f32.xlu1 %v1178_v52 }
 0x31e   :  { %v1181_v53 = vpop.eup %922 }
 0x31f   :  { %677 = vadd.xlane.f32.xlu0 %v1181_v53 }
 0x322   :  { %v1184_v54 = vpop.eup %924 }
 0x323   :  { %v1186_v55 = vpop.eup %926  ;;  %679 = vadd.xlane.f32.xlu1 %v1184_v54 }
 0x324   :  { %681 = vadd.xlane.f32.xlu0 %v1186_v55 }
 0x326   :  { %v1190_v56 = vpop.eup %928 }
 0x327   :  { %683 = vadd.xlane.f32.xlu1 %v1190_v56 }
 0x38e   :  { %v658_v57 = vpop.xlane.xlu0 %657 }
 0x38f   :  { %930 = vrcp.f32 %v658_v57 }
 0x392   :  { %v660_v58 = vpop.xlane.xlu1 %659  ;;  %v654_v59 = vpop.xlane.xlu0 %653 }
 0x393   :  { %932 = vrcp.f32 %v660_v58 }
 0x394   :  { %934 = vrcp.f32 %v654_v59 }
 0x396   :  { %v656_v60 = vpop.xlane.xlu1 %655 }
 0x397   :  { %936 = vrcp.f32 %v656_v60 }
 0x398   :  { %v666_v61 = vpop.xlane.xlu0 %665 }
 0x399   :  { %938 = vrcp.f32 %v666_v61 }
 0x39a   :  { %v668_v62 = vpop.xlane.xlu1 %667 }
 0x39b   :  { %940 = vrcp.f32 %v668_v62 }
 0x39c   :  { %v931_v63 = vpop.eup %930  ;;  %v662_v0 = vpop.xlane.xlu0 %661 }
 0x39d   :  { %v703_v1 = vmul.f32 %v931_v63, %v1138_v16  ;;  %942 = vrcp.f32 %v662_v0 }
 0x39e   :  { %v664_v2 = vpop.xlane.xlu1 %663 }
 0x39f   :  { %719 = vst [vmem:[%s1264_s7 + $0x10] sm:$0xff] %v703_v1  ;;  %944 = vrcp.f32 %v664_v2 }
 0x3a0   :  { %v933_v3 = vpop.eup %932  ;;  %v674_v4 = vpop.xlane.xlu0 %673 }
 0x3a1   :  { %v935_v5 = vpop.eup %934  ;;  %v704_v6 = vmul.f32 %v933_v3, %v1144_v24  ;;  %946 = vrcp.f32 %v674_v4 }
 0x3a2   :  { %v701_v7 = vmul.f32 %v935_v5, %v1141_v21  ;;  %v676_v8 = vpop.xlane.xlu1 %675 }
 0x3a3   :  { %720 = vst [vmem:[%s1264_s7 + $0x18] sm:$0xff] %v704_v6  ;;  %948 = vrcp.f32 %v676_v8 }
 0x3a4   :  { %v937_v9 = vpop.eup %936  ;;  %717 = vst [vmem:[%s1264_s7] sm:$0xff] %v701_v7  ;;  %v670_v10 = vpop.xlane.xlu0 %669 }
 0x3a5   :  { %v702_v11 = vmul.f32 %v937_v9, %v1150_v31  ;;  %950 = vrcp.f32 %v670_v10 }
 0x3a6   :  { %v939_v12 = vpop.eup %938  ;;  %v672_v13 = vpop.xlane.xlu1 %671 }
 0x3a7   :  { %718 = vst [vmem:[%s1264_s7 + $0x8] sm:$0xff] %v702_v11  ;;  %v707_v14 = vmul.f32 %v939_v12, %v1154_v35  ;;  %952 = vrcp.f32 %v672_v13 }
 0x3a8   :  { %v941_v15 = vpop.eup %940  ;;  %v678_v16 = vpop.xlane.xlu0 %677 }
 0x3a9   :  { %723 = vst [vmem:[%s1264_s7 + $0x30] sm:$0xff] %v707_v14  ;;  %v708_v17 = vmul.f32 %v941_v15, %v1157_v37  ;;  %954 = vrcp.f32 %v678_v16 }
 0x3aa   :  { %v943_v18 = vpop.eup %942 }
 0x3ab   :  { %724 = vst [vmem:[%s1264_s7 + $0x38] sm:$0xff] %v708_v17  ;;  %v705_v19 = vmul.f32 %v943_v18, %v1162_v42 }
 0x3ac   :  { %v945_v20 = vpop.eup %944  ;;  %v680_v21 = vpop.xlane.xlu1 %679 }
 0x3ad   :  { %721 = vst [vmem:[%s1264_s7 + $0x20] sm:$0xff] %v705_v19  ;;  %v706_v22 = vmul.f32 %v945_v20, %v1165_v45  ;;  %956 = vrcp.f32 %v680_v21  ;;  %v682_v23 = vpop.xlane.xlu0 %681 }
 0x3ae   :  { %v947_v24 = vpop.eup %946  ;;  %958 = vrcp.f32 %v682_v23 }
 0x3af   :  { %722 = vst [vmem:[%s1264_s7 + $0x28] sm:$0xff] %v706_v22  ;;  %v711_v25 = vmul.f32 %v947_v24, %v1169_v48 }
 0x3b0   :  { %v949_v26 = vpop.eup %948  ;;  %v684_v27 = vpop.xlane.xlu1 %683 }
 0x3b1   :  { %727 = vst [vmem:[%s1264_s7 + $0x50] sm:$0xff] %v711_v25  ;;  %v712_v28 = vmul.f32 %v949_v26, %v1172_v50  ;;  %960 = vrcp.f32 %v684_v27 }
 0x3b2   :  { %v951_v29 = vpop.eup %950 }
 0x3b3   :  { %728 = vst [vmem:[%s1264_s7 + $0x58] sm:$0xff] %v712_v28  ;;  %v709_v30 = vmul.f32 %v951_v29, %v1175_v51 }
 0x3b4   :  { %v953_v31 = vpop.eup %952 }
 0x3b5   :  { %725 = vst [vmem:[%s1264_s7 + $0x40] sm:$0xff] %v709_v30  ;;  %v710_v32 = vmul.f32 %v953_v31, %v1178_v52 }
 0x3b6   :  { %v955_v33 = vpop.eup %954 }
 0x3b7   :  { %726 = vst [vmem:[%s1264_s7 + $0x48] sm:$0xff] %v710_v32  ;;  %v713_v34 = vmul.f32 %v955_v33, %v1181_v53 }
 0x3b9   :  { %729 = vst [vmem:[%s1264_s7 + $0x60] sm:$0xff] %v713_v34 }
 0x3ba   :  { %v957_v35 = vpop.eup %956 }
 0x3bb   :  { %v959_v36 = vpop.eup %958  ;;  %v714_v37 = vmul.f32 %v957_v35, %v1184_v54 }
 0x3bc   :  { %v715_v38 = vmul.f32 %v959_v36, %v1186_v55 }
 0x3bd   :  { %730 = vst [vmem:[%s1264_s7 + $0x68] sm:$0xff] %v714_v37 }
 0x3be   :  { %v961_v39 = vpop.eup %960  ;;  %731 = vst [vmem:[%s1264_s7 + $0x70] sm:$0xff] %v715_v38 }
 0x3bf   :  { %v716_v40 = vmul.f32 %v961_v39, %v1190_v56 }
 0x3c1   :  { %732 = vst [vmem:[%s1264_s7 + $0x78] sm:$0xff] %v716_v40 }

</bundles_post_ra>
